<compile_context>
chip_gen: v6e
topology: v6e:2x2x1
jax: 0.10.0
libtpu: 0.0.40
codegen_flags: <defaults>
</compile_context>

<pallas_src>
import functools

import jax
import jax.numpy as jnp
from jax.experimental import pallas as pl
from jax.experimental.pallas import tpu as pltpu


# ----------------------------- Pallas kernel ------------------------------
def regretnet_kernel(
    x_ref,                                            # (tb, n_agents*n_items)
    w0_ref, b0_ref, w1_ref, b1_ref, w2_ref, b2_ref,   # MLP trunk
    wh_ref, bh_ref,                                   # fused alloc+payment head
    c_ref,                                            # (W, 4*na*ni) fused gather/segment matrix
    r_agent_ref,                                      # (na*ni, na) per-agent item reduce
    allocs_ref, pay_ref,                              # outputs
):
    f32 = jnp.float32
    na_ni, na = r_agent_ref.shape
    x = x_ref[...]

    # ---- MLP trunk: Linear + tanh (input layer + n_hidden_layers=2) ----
    h = jnp.tanh(jnp.dot(x, w0_ref[...], preferred_element_type=f32) + b0_ref[...])
    h = jnp.tanh(jnp.dot(h, w1_ref[...], preferred_element_type=f32) + b1_ref[...])
    h = jnp.tanh(jnp.dot(h, w2_ref[...], preferred_element_type=f32) + b2_ref[...])

    # ---- fused head: [payment logits | softmax-1 scores | softmax-2 scores] ----
    head = jnp.dot(h, wh_ref[...], preferred_element_type=f32) + bh_ref[...]

    # Both axis-wise softmaxes at once: exp of the scores, then ONE matmul with
    # a fused 0/1 matrix yielding [num1 | num2 | den1 | den2] for the truncated
    # allocs[:, :-1, :-1] cells.  Subtracting the per-row global max is a valid
    # stabilizer for every softmax group (exact-arithmetic equivalent).
    e = jnp.exp(head - jnp.max(head, axis=1, keepdims=True))
    g = jnp.dot(e, c_ref[...], preferred_element_type=f32)        # (tb, 4*na_ni)
    den = jnp.maximum(g[:, 2 * na_ni:], 1e-30)                    # underflow guard
    ratio = g[:, :2 * na_ni] * pl.reciprocal(den, approx=False)   # [softmax1 | softmax2]
    allocs = jnp.minimum(ratio[:, :na_ni], ratio[:, na_ni:])      # (tb, na*ni)
    allocs_ref[...] = allocs

    # ---- fractional payment: sigmoid(logits) * per-agent allocated value ----
    frac = pl.reciprocal(1.0 + jnp.exp(-head[:, :na]), approx=False)
    value = jnp.dot(allocs * x, r_agent_ref[...], preferred_element_type=f32)
    pay_ref[...] = frac * value


# ------------------------- constant 0/1 matrices ---------------------------
def make_constant_matrices(n_agents, n_items):
    A = (n_agents + 1) * (n_items + 1)
    na_ni = n_agents * n_items
    W = n_agents + 2 * A                       # fused head width

    k = jnp.arange(A)
    a_k = k // (n_items + 1)
    i_k = k % (n_items + 1)
    j = jnp.arange(na_ni)
    a_j = j // n_items
    i_j = j % n_items

    # numerator gather: the (agent, item) cell matching truncated output j
    match = ((a_k[:, None] == a_j[None, :]) &
             (i_k[:, None] == i_j[None, :])).astype(jnp.float32)  # (A, na*ni)
    # denominator segments: same-item (softmax over agents) / same-agent (over items)
    grp1 = (i_k[:, None] == i_j[None, :]).astype(jnp.float32)     # (A, na*ni)
    grp2 = (a_k[:, None] == a_j[None, :]).astype(jnp.float32)     # (A, na*ni)

    c_mat = jnp.zeros((W, 4 * na_ni), jnp.float32)
    c_mat = c_mat.at[n_agents:n_agents + A, 0:na_ni].set(match)               # num1
    c_mat = c_mat.at[n_agents + A:W, na_ni:2 * na_ni].set(match)              # num2
    c_mat = c_mat.at[n_agents:n_agents + A, 2 * na_ni:3 * na_ni].set(grp1)    # den1
    c_mat = c_mat.at[n_agents + A:W, 3 * na_ni:4 * na_ni].set(grp2)           # den2

    # per-agent reduction over items
    r_agent = (a_j[:, None] == jnp.arange(n_agents)[None, :]).astype(jnp.float32)
    return c_mat, r_agent


# ------------------------------ params ------------------------------------
def glorot(key, shape):
    fan_in, fan_out = shape
    limit = (6.0 / (fan_in + fan_out)) ** 0.5
    return jax.random.uniform(key, shape, jnp.float32, -limit, limit)


def init_params(key, n_agents, n_items, hidden):
    in_size = n_agents * n_items
    A2 = (n_agents + 1) * (n_items + 1) * 2
    ks = jax.random.split(key, 5)
    return dict(
        w0=glorot(ks[0], (in_size, hidden)), b0=jnp.zeros((1, hidden), jnp.float32),
        w1=glorot(ks[1], (hidden, hidden)),  b1=jnp.zeros((1, hidden), jnp.float32),
        w2=glorot(ks[2], (hidden, hidden)),  b2=jnp.zeros((1, hidden), jnp.float32),
        wa=glorot(ks[3], (hidden, A2)),      ba=jnp.zeros((1, A2), jnp.float32),
        wp=glorot(ks[4], (hidden, n_agents)), bp=jnp.zeros((1, n_agents), jnp.float32),
    )


# ------------------------------ host wrapper -------------------------------
def _round_up(x, m):
    return ((x + m - 1) // m) * m


@functools.partial(jax.jit, static_argnums=(2, 3, 4))
def regretnet_forward(reports, params, n_agents, n_items, tb=512):
    B = reports.shape[0]
    in_size = n_agents * n_items
    x = reports.reshape(B, in_size).astype(jnp.float32)

    # Balanced batch tiles: multiples of 8, at most `tb`, minimal padding.
    b8 = _round_up(B, 8)
    n_tiles = -(-b8 // tb)
    tb_eff = _round_up(-(-b8 // n_tiles), 8)
    b_pad = tb_eff * n_tiles
    if b_pad != B:
        x = jnp.pad(x, ((0, b_pad - B), (0, 0)))

    c_mat, r_agent = make_constant_matrices(n_agents, n_items)

    # Fused head: payment logits on lanes [0, n_agents), then the two score halves.
    wh = jnp.concatenate([params['wp'], params['wa']], axis=1)
    bh = jnp.concatenate([params['bp'], params['ba']], axis=1)

    consts = (params['w0'], params['b0'], params['w1'], params['b1'],
              params['w2'], params['b2'], wh, bh, c_mat, r_agent)

    batch_spec = lambda w: pl.BlockSpec((tb_eff, w), lambda i: (i, 0))
    full_spec = lambda arr: pl.BlockSpec(arr.shape, lambda i: (0,) * arr.ndim)

    allocs_flat, payments = pl.pallas_call(
        regretnet_kernel,
        out_shape=(jax.ShapeDtypeStruct((b_pad, in_size), jnp.float32),
                   jax.ShapeDtypeStruct((b_pad, n_agents), jnp.float32)),
        grid_spec=pltpu.PrefetchScalarGridSpec(
            num_scalar_prefetch=0,
            grid=(n_tiles,),
            in_specs=[batch_spec(in_size)] + [full_spec(c) for c in consts],
            out_specs=[batch_spec(in_size), batch_spec(n_agents)],
        ),
        compiler_params=pltpu.CompilerParams(dimension_semantics=("parallel",)),
    )(x, *consts)

    allocs = allocs_flat[:B].reshape(B, n_agents, n_items)
    return allocs, payments[:B]


# ------------------------------ reference ----------------------------------
def reference_forward(reports, params, n_agents, n_items):
    B = reports.shape[0]
    x = reports.reshape(B, -1).astype(jnp.float32)
    h = jnp.tanh(x @ params['w0'] + params['b0'])
    h = jnp.tanh(h @ params['w1'] + params['b1'])
    h = jnp.tanh(h @ params['w2'] + params['b2'])
    scores = h @ params['wa'] + params['ba']
    A = (n_agents + 1) * (n_items + 1)
    first = scores[:, :A].reshape(B, n_agents + 1, n_items + 1)
    second = scores[:, A:].reshape(B, n_agents + 1, n_items + 1)
    allocs = jnp.minimum(jax.nn.softmax(first, axis=1),
                         jax.nn.softmax(second, axis=2))
    frac = jax.nn.sigmoid(h @ params['wp'] + params['bp'])
    payments = frac * jnp.sum(allocs[:, :-1, :-1] * reports, axis=2)
    return allocs[:, :-1, :-1], payments


if __name__ == "__main__":
    n_agents, n_items, hidden = 3, 4, 128   # module defaults: hidden=128, 2 hidden layers
    B = 16

    key = jax.random.PRNGKey(0)
    k_rep, k_par = jax.random.split(key)
    reports = jax.random.uniform(k_rep, (B, n_agents, n_items), jnp.float32)
    params = init_params(k_par, n_agents, n_items, hidden)

    allocs, payments = regretnet_forward(reports, params, n_agents, n_items, 512)
    jax.block_until_ready((allocs, payments))

    ref_allocs, ref_payments = reference_forward(reports, params, n_agents, n_items)
    assert jnp.allclose(allocs, ref_allocs, atol=1e-5, rtol=1e-4)
    assert jnp.allclose(payments, ref_payments, atol=1e-5, rtol=1e-4)

    print("KERNEL_OK")
</pallas_src>

<mosaic_0001>
module attributes {stable_mosaic.version = 11 : i64} {
  func.func @regretnet_kernel(%arg0: i32, %arg1: memref<16x12xf32, #tpu.memory_space<vmem>>, %arg2: memref<12x128xf32, #tpu.memory_space<vmem>>, %arg3: memref<1x128xf32, #tpu.memory_space<vmem>>, %arg4: memref<128x128xf32, #tpu.memory_space<vmem>>, %arg5: memref<1x128xf32, #tpu.memory_space<vmem>>, %arg6: memref<128x128xf32, #tpu.memory_space<vmem>>, %arg7: memref<1x128xf32, #tpu.memory_space<vmem>>, %arg8: memref<128x43xf32, #tpu.memory_space<vmem>>, %arg9: memref<1x43xf32, #tpu.memory_space<vmem>>, %arg10: memref<43x48xf32, #tpu.memory_space<vmem>>, %arg11: memref<12x3xf32, #tpu.memory_space<vmem>>, %arg12: memref<16x12xf32, #tpu.memory_space<vmem>>, %arg13: memref<16x3xf32, #tpu.memory_space<vmem>>) attributes {dimension_semantics = [#tpu.dimension_semantics<parallel>], iteration_bounds = array<i64: 1>, scalar_prefetch = 0 : i64, scratch_operands = 0 : i64, tpu.core_type = #tpu.core_type<tc>, window_params = [{transform_indices = @transform_0, window_bounds = array<i64: 16, 12>}, {pipeline_mode = #tpu.pipeline_mode<synchronous>, transform_indices = @transform_1, window_bounds = array<i64: 12, 128>}, {pipeline_mode = #tpu.pipeline_mode<synchronous>, transform_indices = @transform_2, window_bounds = array<i64: 1, 128>}, {pipeline_mode = #tpu.pipeline_mode<synchronous>, transform_indices = @transform_3, window_bounds = array<i64: 128, 128>}, {pipeline_mode = #tpu.pipeline_mode<synchronous>, transform_indices = @transform_4, window_bounds = array<i64: 1, 128>}, {pipeline_mode = #tpu.pipeline_mode<synchronous>, transform_indices = @transform_5, window_bounds = array<i64: 128, 128>}, {pipeline_mode = #tpu.pipeline_mode<synchronous>, transform_indices = @transform_6, window_bounds = array<i64: 1, 128>}, {pipeline_mode = #tpu.pipeline_mode<synchronous>, transform_indices = @transform_7, window_bounds = array<i64: 128, 43>}, {pipeline_mode = #tpu.pipeline_mode<synchronous>, transform_indices = @transform_8, window_bounds = array<i64: 1, 43>}, {pipeline_mode = #tpu.pipeline_mode<synchronous>, transform_indices = @transform_9, window_bounds = array<i64: 43, 48>}, {pipeline_mode = #tpu.pipeline_mode<synchronous>, transform_indices = @transform_10, window_bounds = array<i64: 12, 3>}, {transform_indices = @transform_11, window_bounds = array<i64: 16, 12>}, {transform_indices = @transform_12, window_bounds = array<i64: 16, 3>}]} {
    %c0 = arith.constant 0 : index
    %c0_0 = arith.constant 0 : index
    %0 = vector.load %arg1[%c0, %c0_0] : memref<16x12xf32, #tpu.memory_space<vmem>>, vector<16x12xf32>
    %c0_1 = arith.constant 0 : index
    %c0_2 = arith.constant 0 : index
    %1 = vector.load %arg2[%c0_1, %c0_2] : memref<12x128xf32, #tpu.memory_space<vmem>>, vector<12x128xf32>
    %cst = arith.constant dense<0.000000e+00> : vector<16x128xf32>
    %2 = tpu.matmul %0, %1, %cst {dimension_numbers = #tpu.dot_dimension_numbers<[1], [0], [0], [1], [0, 0, 1, 1], [], []>} : vector<16x12xf32>, vector<12x128xf32>, vector<16x128xf32> -> vector<16x128xf32>
    %c0_3 = arith.constant 0 : index
    %c0_4 = arith.constant 0 : index
    %3 = vector.load %arg3[%c0_3, %c0_4] : memref<1x128xf32, #tpu.memory_space<vmem>>, vector<1x128xf32>
    %4 = vector.broadcast %3 : vector<1x128xf32> to vector<16x128xf32>
    %5 = arith.addf %2, %4 : vector<16x128xf32>
    %6 = math.tanh %5 : vector<16x128xf32>
    %c0_5 = arith.constant 0 : index
    %c0_6 = arith.constant 0 : index
    %7 = vector.load %arg4[%c0_5, %c0_6] : memref<128x128xf32, #tpu.memory_space<vmem>>, vector<128x128xf32>
    %cst_7 = arith.constant dense<0.000000e+00> : vector<16x128xf32>
    %8 = tpu.matmul %6, %7, %cst_7 {dimension_numbers = #tpu.dot_dimension_numbers<[1], [0], [0], [1], [0, 0, 1, 1], [], []>} : vector<16x128xf32>, vector<128x128xf32>, vector<16x128xf32> -> vector<16x128xf32>
    %c0_8 = arith.constant 0 : index
    %c0_9 = arith.constant 0 : index
    %9 = vector.load %arg5[%c0_8, %c0_9] : memref<1x128xf32, #tpu.memory_space<vmem>>, vector<1x128xf32>
    %10 = vector.broadcast %9 : vector<1x128xf32> to vector<16x128xf32>
    %11 = arith.addf %8, %10 : vector<16x128xf32>
    %12 = math.tanh %11 : vector<16x128xf32>
    %c0_10 = arith.constant 0 : index
    %c0_11 = arith.constant 0 : index
    %13 = vector.load %arg6[%c0_10, %c0_11] : memref<128x128xf32, #tpu.memory_space<vmem>>, vector<128x128xf32>
    %cst_12 = arith.constant dense<0.000000e+00> : vector<16x128xf32>
    %14 = tpu.matmul %12, %13, %cst_12 {dimension_numbers = #tpu.dot_dimension_numbers<[1], [0], [0], [1], [0, 0, 1, 1], [], []>} : vector<16x128xf32>, vector<128x128xf32>, vector<16x128xf32> -> vector<16x128xf32>
    %c0_13 = arith.constant 0 : index
    %c0_14 = arith.constant 0 : index
    %15 = vector.load %arg7[%c0_13, %c0_14] : memref<1x128xf32, #tpu.memory_space<vmem>>, vector<1x128xf32>
    %16 = vector.broadcast %15 : vector<1x128xf32> to vector<16x128xf32>
    %17 = arith.addf %14, %16 : vector<16x128xf32>
    %18 = math.tanh %17 : vector<16x128xf32>
    %c0_15 = arith.constant 0 : index
    %c0_16 = arith.constant 0 : index
    %19 = vector.load %arg8[%c0_15, %c0_16] : memref<128x43xf32, #tpu.memory_space<vmem>>, vector<128x43xf32>
    %cst_17 = arith.constant dense<0.000000e+00> : vector<16x43xf32>
    %20 = tpu.matmul %18, %19, %cst_17 {dimension_numbers = #tpu.dot_dimension_numbers<[1], [0], [0], [1], [0, 0, 1, 1], [], []>} : vector<16x128xf32>, vector<128x43xf32>, vector<16x43xf32> -> vector<16x43xf32>
    %c0_18 = arith.constant 0 : index
    %c0_19 = arith.constant 0 : index
    %21 = vector.load %arg9[%c0_18, %c0_19] : memref<1x43xf32, #tpu.memory_space<vmem>>, vector<1x43xf32>
    %22 = vector.broadcast %21 : vector<1x43xf32> to vector<16x43xf32>
    %23 = arith.addf %20, %22 : vector<16x43xf32>
    %cst_20 = arith.constant dense<0xFF800000> : vector<16xf32>
    %24 = vector.multi_reduction <maximumf>, %23, %cst_20 [1] : vector<16x43xf32> to vector<16xf32>
    %25 = vector.shape_cast %24 : vector<16xf32> to vector<16x1xf32>
    %26 = vector.broadcast %25 : vector<16x1xf32> to vector<16x43xf32>
    %27 = arith.subf %23, %26 : vector<16x43xf32>
    %28 = math.exp %27 : vector<16x43xf32>
    %c0_21 = arith.constant 0 : index
    %c0_22 = arith.constant 0 : index
    %29 = vector.load %arg10[%c0_21, %c0_22] : memref<43x48xf32, #tpu.memory_space<vmem>>, vector<43x48xf32>
    %cst_23 = arith.constant dense<0.000000e+00> : vector<16x48xf32>
    %30 = tpu.matmul %28, %29, %cst_23 {dimension_numbers = #tpu.dot_dimension_numbers<[1], [0], [0], [1], [0, 0, 1, 1], [], []>} : vector<16x43xf32>, vector<43x48xf32>, vector<16x48xf32> -> vector<16x48xf32>
    %31 = vector.extract_strided_slice %30 {offsets = [0, 24], sizes = [16, 24], strides = [1, 1]} : vector<16x48xf32> to vector<16x24xf32>
    %cst_24 = arith.constant 1.000000e-30 : f32
    %32 = vector.broadcast %cst_24 : f32 to vector<16x24xf32>
    %33 = arith.maximumf %31, %32 : vector<16x24xf32>
    %34 = vector.extract_strided_slice %30 {offsets = [0, 0], sizes = [16, 24], strides = [1, 1]} : vector<16x48xf32> to vector<16x24xf32>
    %35 = tpu.reciprocal %33 : vector<16x24xf32> -> vector<16x24xf32>
    %36 = arith.mulf %34, %35 : vector<16x24xf32>
    %37 = vector.extract_strided_slice %36 {offsets = [0, 0], sizes = [16, 12], strides = [1, 1]} : vector<16x24xf32> to vector<16x12xf32>
    %38 = vector.extract_strided_slice %36 {offsets = [0, 12], sizes = [16, 12], strides = [1, 1]} : vector<16x24xf32> to vector<16x12xf32>
    %39 = arith.minimumf %37, %38 : vector<16x12xf32>
    %c0_25 = arith.constant 0 : index
    %c0_26 = arith.constant 0 : index
    %40 = vector.load %arg12[%c0_25, %c0_26] : memref<16x12xf32, #tpu.memory_space<vmem>>, vector<16x12xf32>
    tpu.vector_store %arg12[%c0_25, %c0_26], %39 {strides = array<i32>} : memref<16x12xf32, #tpu.memory_space<vmem>>, vector<16x12xf32>,
    %41 = vector.extract_strided_slice %23 {offsets = [0, 0], sizes = [16, 3], strides = [1, 1]} : vector<16x43xf32> to vector<16x3xf32>
    %cst_27 = arith.constant 0.000000e+00 : f32
    %42 = vector.broadcast %cst_27 : f32 to vector<16x3xf32>
    %43 = arith.subf %42, %41 : vector<16x3xf32>
    %44 = math.exp %43 : vector<16x3xf32>
    %cst_28 = arith.constant 1.000000e+00 : f32
    %45 = vector.broadcast %cst_28 : f32 to vector<16x3xf32>
    %46 = arith.addf %45, %44 : vector<16x3xf32>
    %47 = tpu.reciprocal %46 : vector<16x3xf32> -> vector<16x3xf32>
    %48 = arith.mulf %39, %0 : vector<16x12xf32>
    %c0_29 = arith.constant 0 : index
    %c0_30 = arith.constant 0 : index
    %49 = vector.load %arg11[%c0_29, %c0_30] : memref<12x3xf32, #tpu.memory_space<vmem>>, vector<12x3xf32>
    %cst_31 = arith.constant dense<0.000000e+00> : vector<16x3xf32>
    %50 = tpu.matmul %48, %49, %cst_31 {dimension_numbers = #tpu.dot_dimension_numbers<[1], [0], [0], [1], [0, 0, 1, 1], [], []>} : vector<16x12xf32>, vector<12x3xf32>, vector<16x3xf32> -> vector<16x3xf32>
    %51 = arith.mulf %47, %50 : vector<16x3xf32>
    %c0_32 = arith.constant 0 : index
    %c0_33 = arith.constant 0 : index
    %52 = vector.load %arg13[%c0_32, %c0_33] : memref<16x3xf32, #tpu.memory_space<vmem>>, vector<16x3xf32>
    tpu.vector_store %arg13[%c0_32, %c0_33], %51 {strides = array<i32>} : memref<16x3xf32, #tpu.memory_space<vmem>>, vector<16x3xf32>,
    return
  }
  func.func @transform_0(%arg0: i32) -> (i32, i32) {
    %c0_i32 = arith.constant 0 : i32
    %c0_i32_0 = arith.constant 0 : i32
    return %arg0, %c0_i32 : i32, i32
  }
  func.func @transform_1(%arg0: i32) -> (i32, i32) {
    %c0_i32 = arith.constant 0 : i32
    %c0_i32_0 = arith.constant 0 : i32
    %c0_i32_1 = arith.constant 0 : i32
    return %c0_i32, %c0_i32_0 : i32, i32
  }
  func.func @transform_2(%arg0: i32) -> (i32, i32) {
    %c0_i32 = arith.constant 0 : i32
    %c0_i32_0 = arith.constant 0 : i32
    %c0_i32_1 = arith.constant 0 : i32
    return %c0_i32, %c0_i32_0 : i32, i32
  }
  func.func @transform_3(%arg0: i32) -> (i32, i32) {
    %c0_i32 = arith.constant 0 : i32
    %c0_i32_0 = arith.constant 0 : i32
    %c0_i32_1 = arith.constant 0 : i32
    return %c0_i32, %c0_i32_0 : i32, i32
  }
  func.func @transform_4(%arg0: i32) -> (i32, i32) {
    %c0_i32 = arith.constant 0 : i32
    %c0_i32_0 = arith.constant 0 : i32
    %c0_i32_1 = arith.constant 0 : i32
    return %c0_i32, %c0_i32_0 : i32, i32
  }
  func.func @transform_5(%arg0: i32) -> (i32, i32) {
    %c0_i32 = arith.constant 0 : i32
    %c0_i32_0 = arith.constant 0 : i32
    %c0_i32_1 = arith.constant 0 : i32
    return %c0_i32, %c0_i32_0 : i32, i32
  }
  func.func @transform_6(%arg0: i32) -> (i32, i32) {
    %c0_i32 = arith.constant 0 : i32
    %c0_i32_0 = arith.constant 0 : i32
    %c0_i32_1 = arith.constant 0 : i32
    return %c0_i32, %c0_i32_0 : i32, i32
  }
  func.func @transform_7(%arg0: i32) -> (i32, i32) {
    %c0_i32 = arith.constant 0 : i32
    %c0_i32_0 = arith.constant 0 : i32
    %c0_i32_1 = arith.constant 0 : i32
    return %c0_i32, %c0_i32_0 : i32, i32
  }
  func.func @transform_8(%arg0: i32) -> (i32, i32) {
    %c0_i32 = arith.constant 0 : i32
    %c0_i32_0 = arith.constant 0 : i32
    %c0_i32_1 = arith.constant 0 : i32
    return %c0_i32, %c0_i32_0 : i32, i32
  }
  func.func @transform_9(%arg0: i32) -> (i32, i32) {
    %c0_i32 = arith.constant 0 : i32
    %c0_i32_0 = arith.constant 0 : i32
    %c0_i32_1 = arith.constant 0 : i32
    return %c0_i32, %c0_i32_0 : i32, i32
  }
  func.func @transform_10(%arg0: i32) -> (i32, i32) {
    %c0_i32 = arith.constant 0 : i32
    %c0_i32_0 = arith.constant 0 : i32
    %c0_i32_1 = arith.constant 0 : i32
    return %c0_i32, %c0_i32_0 : i32, i32
  }
  func.func @transform_11(%arg0: i32) -> (i32, i32) {
    %c0_i32 = arith.constant 0 : i32
    %c0_i32_0 = arith.constant 0 : i32
    return %arg0, %c0_i32 : i32, i32
  }
  func.func @transform_12(%arg0: i32) -> (i32, i32) {
    %c0_i32 = arith.constant 0 : i32
    %c0_i32_0 = arith.constant 0 : i32
    return %arg0, %c0_i32 : i32, i32
  }
}

</mosaic_0001>

<bundles_post_ra>
// kernel: regretnet_forward.1
= control target key start
LH: loop header
LB: loop body
LE: loop exit
PB: predicated region body
PF: predicated region fallthrough
CT: control target
= control target key end

     0   :  { %vm58_vm0 = vcmask 1043456   ;;  %vm51_vm1 = vcmask 97280   ;;  %vm437_vm2 = vcmask 351232   ;;  %vm462_vm3 = vcmask 1042432   ;;  %s926_s16 = smov 116   ;;  %s1228_s1 = inlined_call_operand.vmem [shape: f32[12,128], index: 1, kind: input, shape index: {}]   ;;  %s1229_s0 = inlined_call_operand.vmem [shape: f32[16,12], index: 0, kind: input, shape index: {}]   ;;  %s1230_s3 = inlined_call_operand.vmem [shape: f32[128,128], index: 3, kind: input, shape index: {}]   ;;  %s1231_s5 = inlined_call_operand.vmem [shape: f32[128,128], index: 5, kind: input, shape index: {}]   ;;  %s1232_s2 = inlined_call_operand.vmem [shape: f32[1,128], index: 2, kind: input, shape index: {}]   ;;  %s1233_s7 = inlined_call_operand.vmem [shape: f32[128,43], index: 7, kind: input, shape index: {}]   ;;  %s1234_s4 = inlined_call_operand.vmem [shape: f32[1,128], index: 4, kind: input, shape index: {}]   ;;  %s1235_s6 = inlined_call_operand.vmem [shape: f32[1,128], index: 6, kind: input, shape index: {}]   ;;  %s1236_s8 = inlined_call_operand.vmem [shape: f32[1,43], index: 8, kind: input, shape index: {}]   ;;  %s1237_s9 = inlined_call_operand.vmem [shape: f32[43,48], index: 9, kind: input, shape index: {}]   ;;  %s1238_s10 = inlined_call_operand.vmem [shape: f32[12,3], index: 10, kind: input, shape index: {}]   ;;  %s1239_s11 = inlined_call_operand.vmem [shape: f32[16,12], index: 11, kind: output, shape index: {0}]   ;;  %s1240_s12 = inlined_call_operand.vmem [shape: f32[16,3], index: 12, kind: output, shape index: {1}]  }
   0x1   :  { %v43_v0 = vld [vmem:[%s1228_s1 + $0x8] sm:$0xf]  ;;  %v42_v1 = vld [vmem:[%s1228_s1] sm:$0xff]  ;;  %v154_v3 = vld [vmem:[%s1230_s3 + $0x78] sm:$0xff]  ;;  %vm667_vm4 = vcmask 23552  }
   0x2   :  { %v1001_v2 = vld [vmem:[%s1229_s0] sm:$0xff]  ;;  %761 = vmatprep.subr.msk.mxu0 %vm58_vm0, %v43_v0  ;;  %v153_v4 = vld [vmem:[%s1230_s3 + $0x70] sm:$0xff]  ;;  %v1016_v5 = vld [vmem:[%s1229_s0 + $0x8] sm:$0xff]  ;;  %768 = vmatprep.subr.mxu1 %v154_v3 }
   0x3   :  { %765 = vmatprep.mubr.msk.f32.mxu0 %vm51_vm1, %v1001_v2  ;;  %762 = vmatpush3.msk.msra.mxu0 %vm58_vm0, %v43_v0  ;;  %v152_v6 = vld [vmem:[%s1230_s3 + $0x68] sm:$0xff]  ;;  %v151_v7 = vld [vmem:[%s1230_s3 + $0x60] sm:$0xff]  ;;  %v150_v8 = vld [vmem:[%s1230_s3 + $0x58] sm:$0xff] }
   0x4   :  { %763 = vmatprep.subr.mxu0 %v42_v1  ;;  %769 = vmatpush3.msra.mxu1 %v154_v3  ;;  %v149_v9 = vld [vmem:[%s1230_s3 + $0x50] sm:$0xff]  ;;  %v148_v10 = vld [vmem:[%s1230_s3 + $0x48] sm:$0xff]  ;;  %v147_v11 = vld [vmem:[%s1230_s3 + $0x40] sm:$0xff] }
   0x5   :  { %764 = vmatpush3.msra.mxu0 %v42_v1  ;;  %770 = vmatprep.subr.mxu1 %v153_v4  ;;  %v146_v12 = vld [vmem:[%s1230_s3 + $0x38] sm:$0xff]  ;;  %v145_v13 = vld [vmem:[%s1230_s3 + $0x30] sm:$0xff]  ;;  %v144_v14 = vld [vmem:[%s1230_s3 + $0x28] sm:$0xff] }
   0x6   :  { %766 = vmatmul.mubr.msk.f32.vlgmr.msra.gmra.mxu0 %vm51_vm1, %v1016_v5  ;;  %771 = vmatpush3.msra.mxu1 %v153_v4  ;;  %v143_v15 = vld [vmem:[%s1230_s3 + $0x20] sm:$0xff]  ;;  %v142_v16 = vld [vmem:[%s1230_s3 + $0x18] sm:$0xff]  ;;  %v141_v17 = vld [vmem:[%s1230_s3 + $0x10] sm:$0xff] }
   0x7   :  { %772 = vmatprep.subr.mxu1 %v152_v6  ;;  %v140_v18 = vld [vmem:[%s1230_s3 + $0x8] sm:$0xff]  ;;  %v139_v19 = vld [vmem:[%s1230_s3] sm:$0xff]  ;;  %v254_v20 = vld [vmem:[%s1231_s5 + $0x78] sm:$0xff] }
   0x8   :  { %773 = vmatpush3.msra.mxu1 %v152_v6  ;;  %v253_v21 = vld [vmem:[%s1231_s5 + $0x70] sm:$0xff]  ;;  %803 = vmatprep.subr.mxu0 %v254_v20  ;;  %v252_v22 = vld [vmem:[%s1231_s5 + $0x68] sm:$0xff]  ;;  %v251_v23 = vld [vmem:[%s1231_s5 + $0x60] sm:$0xff] }
   0x9   :  { %774 = vmatprep.subr.mxu1 %v151_v7  ;;  %804 = vmatpush3.msra.mxu0 %v254_v20  ;;  %v250_v24 = vld [vmem:[%s1231_s5 + $0x58] sm:$0xff]  ;;  %v249_v25 = vld [vmem:[%s1231_s5 + $0x50] sm:$0xff]  ;;  %v678_v26 = vld [vmem:[%s1232_s2] ss:$0 sm:$0xff] }
   0xa   :  { %775 = vmatpush3.msra.mxu1 %v151_v7  ;;  %805 = vmatprep.subr.mxu0 %v253_v21  ;;  %v248_v33 = vld [vmem:[%s1231_s5 + $0x48] sm:$0xff]  ;;  %v247_v34 = vld [vmem:[%s1231_s5 + $0x40] sm:$0xff]  ;;  %v246_v35 = vld [vmem:[%s1231_s5 + $0x38] sm:$0xff] }
   0xb   :  { %776 = vmatprep.subr.mxu1 %v150_v8  ;;  %806 = vmatpush3.msra.mxu0 %v253_v21  ;;  %v245_v36 = vld [vmem:[%s1231_s5 + $0x30] sm:$0xff]  ;;  %v244_v37 = vld [vmem:[%s1231_s5 + $0x28] sm:$0xff]  ;;  %v243_v38 = vld [vmem:[%s1231_s5 + $0x20] sm:$0xff] }
   0xc   :  { %777 = vmatpush3.msra.mxu1 %v150_v8  ;;  %807 = vmatprep.subr.mxu0 %v252_v22  ;;  %v242_v39 = vld [vmem:[%s1231_s5 + $0x18] sm:$0xff]  ;;  %v241_v40 = vld [vmem:[%s1231_s5 + $0x10] sm:$0xff]  ;;  %v240_v41 = vld [vmem:[%s1231_s5 + $0x8] sm:$0xff] }
   0xd   :  { %778 = vmatprep.subr.mxu1 %v149_v9  ;;  %808 = vmatpush3.msra.mxu0 %v252_v22  ;;  %v239_v42 = vld [vmem:[%s1231_s5] sm:$0xff]  ;;  %v354_v43 = vld [vmem:[%s1233_s7 + $0x78] sm:$0xff]  ;;  %v353_v44 = vld [vmem:[%s1233_s7 + $0x70] sm:$0xff] }
   0xe   :  { %779 = vmatpush3.msra.mxu1 %v149_v9  ;;  %809 = vmatprep.subr.mxu0 %v251_v23  ;;  %v352_v45 = vld [vmem:[%s1233_s7 + $0x68] sm:$0xff]  ;;  %v351_v46 = vld [vmem:[%s1233_s7 + $0x60] sm:$0xff]  ;;  %v350_v47 = vld [vmem:[%s1233_s7 + $0x58] sm:$0xff] }
   0xf   :  { %780 = vmatprep.subr.mxu1 %v148_v10  ;;  %810 = vmatpush3.msra.mxu0 %v251_v23  ;;  %v349_v48 = vld [vmem:[%s1233_s7 + $0x50] sm:$0xff]  ;;  %v682_v49 = vld [vmem:[%s1234_s4] ss:$0 sm:$0xff]  ;;  %v348_v56 = vld [vmem:[%s1233_s7 + $0x48] sm:$0xff] }
  0x10   :  { %781 = vmatpush3.msra.mxu1 %v148_v10  ;;  %811 = vmatprep.subr.mxu0 %v250_v24  ;;  %v347_v57 = vld [vmem:[%s1233_s7 + $0x40] sm:$0xff]  ;;  %v346_v58 = vld [vmem:[%s1233_s7 + $0x38] sm:$0xff]  ;;  %v345_v59 = vld [vmem:[%s1233_s7 + $0x30] sm:$0xff] }
  0x11   :  { %782 = vmatprep.subr.mxu1 %v147_v11  ;;  %812 = vmatpush3.msra.mxu0 %v250_v24  ;;  %v344_v60 = vld [vmem:[%s1233_s7 + $0x28] sm:$0xff]  ;;  %v343_v61 = vld [vmem:[%s1233_s7 + $0x20] sm:$0xff]  ;;  %v342_v62 = vld [vmem:[%s1233_s7 + $0x18] sm:$0xff] }
  0x12   :  { %783 = vmatpush3.msra.mxu1 %v147_v11  ;;  %813 = vmatprep.subr.mxu0 %v249_v25  ;;  %v341_v63 = vld [vmem:[%s1233_s7 + $0x10] sm:$0xff]  ;;  %v340_v0 = vld [vmem:[%s1233_s7 + $0x8] sm:$0xff]  ;;  %v339_v1 = vld [vmem:[%s1233_s7] sm:$0xff] }
  0x13   :  { %784 = vmatprep.subr.mxu1 %v146_v12  ;;  %814 = vmatpush3.msra.mxu0 %v249_v25  ;;  %v683_v3 = vld [vmem:[%s1235_s6] ss:$0 sm:$0xff]  ;;  %v453_v20 = vld [vmem:[%s1237_s9 + $0x18] sm:$0xff]  ;;  %v452_v21 = vld [vmem:[%s1237_s9 + $0x10] sm:$0xff] }
  0x14   :  { %785 = vmatpush3.msra.mxu1 %v146_v12  ;;  %815 = vmatprep.subr.mxu0 %v248_v33  ;;  %v684_v12 = vld [vmem:[%s1236_s8] ss:$0 sm:$0xff]  ;;  %v451_v22 = vld [vmem:[%s1237_s9 + $0x8] sm:$0xff] }
  0x15   :  { %786 = vmatprep.subr.mxu1 %v145_v13  ;;  %816 = vmatpush3.msra.mxu0 %v248_v33  ;;  %v450_v23 = vld [vmem:[%s1237_s9] sm:$0xff] }
  0x16   :  { %787 = vmatpush3.msra.mxu1 %v145_v13  ;;  %817 = vmatprep.subr.mxu0 %v247_v34 }
  0x17   :  { %788 = vmatprep.subr.mxu1 %v144_v14  ;;  %818 = vmatpush3.msra.mxu0 %v247_v34 }
  0x18   :  { %789 = vmatpush3.msra.mxu1 %v144_v14  ;;  %819 = vmatprep.subr.mxu0 %v246_v35 }
  0x19   :  { %790 = vmatprep.subr.mxu1 %v143_v15  ;;  %820 = vmatpush3.msra.mxu0 %v246_v35 }
  0x1a   :  { %791 = vmatpush3.msra.mxu1 %v143_v15  ;;  %821 = vmatprep.subr.mxu0 %v245_v36 }
  0x1b   :  { %792 = vmatprep.subr.mxu1 %v142_v16  ;;  %822 = vmatpush3.msra.mxu0 %v245_v36 }
  0x1c   :  { %793 = vmatpush3.msra.mxu1 %v142_v16  ;;  %823 = vmatprep.subr.mxu0 %v244_v37 }
  0x1d   :  { %794 = vmatprep.subr.mxu1 %v141_v17  ;;  %824 = vmatpush3.msra.mxu0 %v244_v37 }
  0x1e   :  { %795 = vmatpush3.msra.mxu1 %v141_v17  ;;  %825 = vmatprep.subr.mxu0 %v243_v38 }
  0x1f   :  { %796 = vmatprep.subr.mxu1 %v140_v18  ;;  %826 = vmatpush3.msra.mxu0 %v243_v38  ;;  %v580_v38 = vld [vmem:[%s1238_s10 + $0x8] sm:$0xf] }
  0x20   :  { %797 = vmatpush3.msra.mxu1 %v140_v18  ;;  %827 = vmatprep.subr.mxu0 %v242_v39  ;;  %v455_v18 = vld [vmem:[%s1237_s9 + $0x28] sm:$0x7] }
  0x21   :  { %798 = vmatprep.subr.mxu1 %v139_v19  ;;  %828 = vmatpush3.msra.mxu0 %v242_v39  ;;  %v579_v39 = vld [vmem:[%s1238_s10] sm:$0xff] }
  0x22   :  { %799 = vmatpush3.msra.mxu1 %v139_v19  ;;  %829 = vmatprep.subr.mxu0 %v241_v40  ;;  %v454_v19 = vld [vmem:[%s1237_s9 + $0x20] sm:$0xff]  ;;  %s925_s9 = smov 104  }
  0x23   :  { %830 = vmatpush3.msra.mxu0 %v241_v40  ;;  %838 = vmatprep.subr.mxu1 %v354_v43 }
  0x24   :  { %831 = vmatprep.subr.mxu0 %v240_v41 }
  0x25   :  { %832 = vmatpush3.msra.mxu0 %v240_v41 }
  0x26   :  { %833 = vmatprep.subr.mxu0 %v239_v42 }
  0x27   :  { %834 = vmatpush3.msra.mxu0 %v239_v42 }
  0x28   :  { %873 = vmatprep.subr.msk.mxu0 %vm462_vm3, %v455_v18 }
  0xc6   :  { %v767_v27 = vpop.f32.mrf.mxu0 }
  0xc7   :  { %v134_v28 = vadd.f32 %v767_v27, %v678_v26 }
  0xc8   :  { %v128_v29 = vpop.f32.mrf.mxu0 }
  0xc9   :  { %v129_v30 = vadd.f32 %v678_v26, %v128_v29 }
  0xcb   :  { %897 = vtanh.f32 %v129_v30 }
  0xcc   :  { %899 = vtanh.f32 %v134_v28 }
  0xd8   :  { %v898_v31 = vpop.eup %897 }
  0xd9   :  { %v900_v32 = vpop.eup %899  ;;  %800 = vmatprep.mubr.f32.mxu1 %v898_v31 }
  0xda   :  { %801 = vmatmul.mubr.f32.vlgmr.msra.gmra.mxu1 %v900_v32 }
  0xdb   :  { %839 = vmatpush3.msra.mxu1 %v354_v43 }
  0xdc   :  { %840 = vmatprep.subr.mxu1 %v353_v44 }
  0xdd   :  { %841 = vmatpush3.msra.mxu1 %v353_v44 }
  0xde   :  { %842 = vmatprep.subr.mxu1 %v352_v45 }
  0xdf   :  { %843 = vmatpush3.msra.mxu1 %v352_v45 }
  0xe0   :  { %844 = vmatprep.subr.mxu1 %v351_v46 }
  0xe1   :  { %845 = vmatpush3.msra.mxu1 %v351_v46 }
  0xe2   :  { %846 = vmatprep.subr.mxu1 %v350_v47 }
  0xe3   :  { %847 = vmatpush3.msra.mxu1 %v350_v47 }
  0xe4   :  { %848 = vmatprep.subr.mxu1 %v349_v48 }
  0xe5   :  { %849 = vmatpush3.msra.mxu1 %v349_v48 }
  0xe6   :  { %850 = vmatprep.subr.mxu1 %v348_v56 }
  0xe7   :  { %851 = vmatpush3.msra.mxu1 %v348_v56 }
  0xe8   :  { %852 = vmatprep.subr.mxu1 %v347_v57 }
  0xe9   :  { %853 = vmatpush3.msra.mxu1 %v347_v57 }
  0xea   :  { %854 = vmatprep.subr.mxu1 %v346_v58 }
  0xeb   :  { %855 = vmatpush3.msra.mxu1 %v346_v58 }
  0xec   :  { %856 = vmatprep.subr.mxu1 %v345_v59 }
  0xed   :  { %857 = vmatpush3.msra.mxu1 %v345_v59 }
  0xee   :  { %858 = vmatprep.subr.mxu1 %v344_v60 }
  0xef   :  { %859 = vmatpush3.msra.mxu1 %v344_v60 }
  0xf0   :  { %860 = vmatprep.subr.mxu1 %v343_v61 }
  0xf1   :  { %861 = vmatpush3.msra.mxu1 %v343_v61 }
  0xf2   :  { %862 = vmatprep.subr.mxu1 %v342_v62 }
  0xf3   :  { %863 = vmatpush3.msra.mxu1 %v342_v62 }
  0xf4   :  { %864 = vmatprep.subr.mxu1 %v341_v63 }
  0xf5   :  { %865 = vmatpush3.msra.mxu1 %v341_v63 }
  0xf6   :  { %866 = vmatprep.subr.mxu1 %v340_v0 }
  0xf7   :  { %867 = vmatpush3.msra.mxu1 %v340_v0 }
  0xf8   :  { %868 = vmatprep.subr.mxu1 %v339_v1 }
  0xf9   :  { %869 = vmatpush3.msra.mxu1 %v339_v1 }
 0x19a   :  { %v802_v50 = vpop.f32.mrf.mxu1 }
 0x19b   :  { %v234_v51 = vadd.f32 %v802_v50, %v682_v49 }
 0x19c   :  { %v228_v52 = vpop.f32.mrf.mxu1 }
 0x19d   :  { %v229_v53 = vadd.f32 %v682_v49, %v228_v52 }
 0x19f   :  { %901 = vtanh.f32 %v229_v53 }
 0x1a0   :  { %903 = vtanh.f32 %v234_v51 }
 0x1ac   :  { %v902_v54 = vpop.eup %901 }
 0x1ad   :  { %v904_v55 = vpop.eup %903  ;;  %835 = vmatprep.mubr.f32.mxu0 %v902_v54 }
 0x1ae   :  { %836 = vmatmul.mubr.f32.vlgmr.msra.gmra.mxu0 %v904_v55 }
 0x1af   :  { %874 = vmatpush3.msk.msra.mxu0 %vm462_vm3, %v455_v18 }
 0x1b0   :  { %875 = vmatprep.subr.mxu0 %v454_v19 }
 0x1b1   :  { %876 = vmatpush3.msra.mxu0 %v454_v19 }
 0x1b2   :  { %877 = vmatprep.subr.mxu0 %v453_v20 }
 0x1b3   :  { %878 = vmatpush3.msra.mxu0 %v453_v20 }
 0x1b4   :  { %879 = vmatprep.subr.mxu0 %v452_v21 }
 0x1b5   :  { %880 = vmatpush3.msra.mxu0 %v452_v21 }
 0x1b6   :  { %881 = vmatprep.subr.mxu0 %v451_v22 }
 0x1b7   :  { %882 = vmatpush3.msra.mxu0 %v451_v22 }
 0x1b8   :  { %883 = vmatprep.subr.mxu0 %v450_v23 }
 0x1b9   :  { %884 = vmatpush3.msra.mxu0 %v450_v23 }
 0x1ba   :  { %888 = vmatprep.subr.msk.mxu0 %vm58_vm0, %v580_v38 }
 0x26e   :  { %v837_v4 = vpop.f32.mrf.mxu0 }
 0x26f   :  { %v334_v6 = vadd.f32 %v837_v4, %v683_v3 }
 0x270   :  { %v328_v7 = vpop.f32.mrf.mxu0 }
 0x271   :  { %v329_v8 = vadd.f32 %v683_v3, %v328_v7 }
 0x273   :  { %905 = vtanh.f32 %v329_v8 }
 0x274   :  { %907 = vtanh.f32 %v334_v6 }
 0x280   :  { %v906_v9 = vpop.eup %905 }
 0x281   :  { %v908_v10 = vpop.eup %907  ;;  %870 = vmatprep.mubr.f32.mxu1 %v906_v9 }
 0x282   :  { %871 = vmatmul.mubr.f32.vlgmr.msra.gmra.mxu1 %v908_v10 }
 0x342   :  { %v872_v11 = vpop.f32.mrf.mxu1 }
 0x343   :  { %v1172_v15 = vadd.f32 %v872_v11, %v684_v12 }
 0x344   :  { %v428_v13 = vpop.f32.mrf.mxu1 }
 0x345   :  { %v1170_v14 = vadd.f32 %v684_v12, %v428_v13  ;;  %v441_v17 = vsel %vm437_vm2, %v1172_v15, -inf  ;;  %v568_v50 = vsub.f32 0.0, %v1172_v15 }
 0x347   :  { %v438_v16 = vsel %vm437_vm2, %v1170_v14, -inf  ;;  %v567_v51 = vsub.f32 0.0, %v1170_v14  ;;  %v571_v52 = vmul.f32 1.442695, %v568_v50 }
 0x348   :  { %439 = vmax.xlane.f32.xlu0 %v438_v16 }
 0x349   :  { %v569_v53 = vmul.f32 1.442695, %v567_v51 }
 0x34c   :  { %442 = vmax.xlane.f32.xlu0 %v441_v17 }
 0x3d1   :  { %v440_v24 = vpop.xlane.xlu0 %439 }
 0x3d2   :  { %v444_v25 = vsub.f32 %v1170_v14, %v440_v24 }
 0x3d4   :  { %v446_v26 = vmul.f32 1.442695, %v444_v25 }
 0x3d5   :  { %v443_v27 = vpop.xlane.xlu0 %442 }
 0x3d6   :  { %909 = vpow2.f32 %v446_v26  ;;  %v445_v28 = vsub.f32 %v1172_v15, %v443_v27 }
 0x3d8   :  { %v448_v29 = vmul.f32 1.442695, %v445_v28 }
 0x3da   :  { %911 = vpow2.f32 %v448_v29 }
 0x3e3   :  { %v910_v30 = vpop.eup %909 }
 0x3e4   :  { %885 = vmatprep.mubr.msk.f32.mxu0 %vm437_vm2, %v910_v30 }
 0x3e7   :  { %v912_v31 = vpop.eup %911 }
 0x3e8   :  { %886 = vmatmul.mubr.msk.f32.vlgmr.msra.gmra.mxu0 %vm437_vm2, %v912_v31 }
 0x3e9   :  { %889 = vmatpush3.msk.msra.mxu0 %vm58_vm0, %v580_v38 }
 0x3ea   :  { %890 = vmatprep.subr.mxu0 %v579_v39 }
 0x3eb   :  { %891 = vmatpush3.msra.mxu0 %v579_v39 }
 0x4a8   :  { %v887_v32 = vpop.f32.mrf.mxu0 }
 0x4a9   :  { %v542_v35 = vmax.f32 %v887_v32, 1e-30 }
 0x4aa   :  { %v532_v33 = vpop.f32.mrf.mxu0 }
 0x4ab   :  { %v541_v34 = vmax.f32 %v532_v33, 1e-30 }
 0x4ad   :  { %913 = vrcp.f32 %v541_v34 }
 0x4ae   :  { %915 = vrcp.f32 %v542_v35 }
 0x4af   :  { %917 = vpow2.f32 %v571_v52 }
 0x4b0   :  { %919 = vpow2.f32 %v569_v53 }
 0x4ba   :  { %v914_v36 = vpop.eup %913 }
 0x4bb   :  { %547 = vrot.lane.b32.xlu1 %v914_v36, %s925_s9  ;;  %v916_v37 = vpop.eup %915 }
 0x4bf   :  { %549 = vrot.lane.b32.xlu1 %v916_v37, %s925_s9 }
 0x52d   :  { %v548_v40 = vpop.permute.xlu1 %547 }
 0x52e   :  { %v553_v41 = vmul.f32 %v548_v40, %v532_v33 }
 0x530   :  { %557 = vrot.lane.b32.xlu0 %v553_v41, %s926_s16 }
 0x531   :  { %v550_v42 = vpop.permute.xlu1 %549 }
 0x532   :  { %v554_v43 = vmul.f32 %v887_v32, %v550_v42 }
 0x534   :  { %559 = vrot.lane.b32.xlu1 %v554_v43, %s926_s16 }
 0x5a2   :  { %v558_v44 = vpop.permute.xlu0 %557 }
 0x5a3   :  { %v563_v45 = vmin.f32 %v553_v41, %v558_v44 }
 0x5a5   :  { %565 = vst.msk [vmem:[%s1239_s11] sm:$0xff] %vm51_vm1, %v563_v45  ;;  %v577_v46 = vmul.f32 %v563_v45, %v1001_v2  ;;  %v918_v2 = vpop.eup %917 }
 0x5a6   :  { %v560_v47 = vpop.permute.xlu1 %559  ;;  %v920_v54 = vpop.eup %919  ;;  %v574_v55 = vadd.f32 1.0, %v918_v2 }
 0x5a7   :  { %v564_v48 = vmin.f32 %v554_v43, %v560_v47  ;;  %892 = vmatprep.mubr.msk.f32.mxu0 %vm51_vm1, %v577_v46  ;;  %v573_v56 = vadd.f32 1.0, %v920_v54 }
 0x5a8   :  { %921 = vrcp.f32 %v574_v55 }
 0x5a9   :  { %566 = vst.msk [vmem:[%s1239_s11 + $0x8] sm:$0xff] %vm51_vm1, %v564_v48  ;;  %v578_v49 = vmul.f32 %v564_v48, %v1016_v5  ;;  %923 = vrcp.f32 %v573_v56 }
 0x5ab   :  { %893 = vmatmul.mubr.msk.f32.vlgmr.msra.gmra.mxu0 %vm51_vm1, %v578_v49 }
 0x5b5   :  { %v922_v57 = vpop.eup %921 }
 0x5b6   :  { %v924_v59 = vpop.eup %923 }
 0x66b   :  { %v894_v58 = vpop.f32.mrf.mxu0 }
 0x66c   :  { %v666_v5 = vmul.f32 %v922_v57, %v894_v58 }
 0x66d   :  { %v656_v60 = vpop.f32.mrf.mxu0 }
 0x66e   :  { %669 = vst.msk [vmem:[%s1240_s12 + $0x8] sm:$0xff] %vm667_vm4, %v666_v5  ;;  %v665_v61 = vmul.f32 %v924_v59, %v656_v60 }
 0x670   :  { %668 = vst.msk [vmem:[%s1240_s12] sm:$0xff] %vm667_vm4, %v665_v61 }

</bundles_post_ra>
